<compile_context>
chip_gen: v5e
topology: v5e:2x2
jax: 0.10.0
libtpu: 0.0.40
codegen_flags: <defaults>
</compile_context>

<pallas_src>
from functools import partial

import jax
import jax.numpy as jnp
from jax.experimental import pallas as pl
from jax.experimental.pallas import tpu as pltpu

LANES = 128
SUBLANES = 8
MAX_ROW_TILE = 4096  # rows per block -> 2 MiB per f32 block


# ----------------------------- kernel ----------------------------------------
def _relu_kernel(x_ref, o_ref):
    # Elementwise max(x, 0) on the whole VMEM tile (VPU).
    o_ref[...] = jnp.maximum(x_ref[...], jnp.zeros((), x_ref.dtype))


# ----------------------------- tiling helper ----------------------------------
def _choose_block_rows(rows: int) -> int:
    """Pick a balanced row tile: multiple of 8, even block count, <= ~4096."""
    if rows <= MAX_ROW_TILE:
        return rows  # single full-extent block (always legal)
    num_blocks = -(-rows // MAX_ROW_TILE)        # cdiv
    if num_blocks % 2:
        num_blocks += 1                          # even count -> megacore balance
    block_rows = -(-rows // num_blocks)          # cdiv
    block_rows = ((block_rows + SUBLANES - 1) // SUBLANES) * SUBLANES
    return block_rows


def _relu_2d(x2d: jax.Array) -> jax.Array:
    rows = x2d.shape[0]
    block_rows = _choose_block_rows(rows)
    grid = (pl.cdiv(rows, block_rows),)
    return pl.pallas_call(
        _relu_kernel,
        out_shape=jax.ShapeDtypeStruct(x2d.shape, x2d.dtype),
        grid=grid,
        in_specs=[pl.BlockSpec((block_rows, LANES), lambda i: (i, 0))],
        out_specs=pl.BlockSpec((block_rows, LANES), lambda i: (i, 0)),
        input_output_aliases={0: 0},  # in-place (input is donated by the jit)
        compiler_params=pltpu.CompilerParams(
            dimension_semantics=("parallel",),
            vmem_limit_bytes=32 * 1024 * 1024,
        ),
    )(x2d)


# ----------------------------- wrapper ----------------------------------------
@partial(jax.jit, donate_argnums=(0,))
def relu_pallas(x: jax.Array) -> jax.Array:
    """ReLU via a Pallas TPU kernel. Input is donated (torch relu_ semantics)."""
    orig_shape = x.shape
    dtype = x.dtype
    n = x.size
    if n == 0:
        return x

    flat = x.reshape(-1)
    n_aligned = (n // LANES) * LANES
    tail_len = n - n_aligned

    pieces = []
    if n_aligned:
        rows = n_aligned // LANES
        main2d = flat[:n_aligned].reshape(rows, LANES)
        pieces.append(_relu_2d(main2d).reshape(-1))
    if tail_len:
        # <128-element tail: plain VPU max, no pad / extra HBM pass.
        pieces.append(jnp.maximum(flat[n_aligned:], jnp.zeros((), dtype)))

    out_flat = pieces[0] if len(pieces) == 1 else jnp.concatenate(pieces)
    return out_flat.reshape(orig_shape)


# ----------------------------- module-equivalent ------------------------------
class MPallas:
    """JAX/Pallas equivalent of the PyTorch module M (a single inplace ReLU)."""

    def __init__(self):
        pass  # ReLU has no parameters.

    def __call__(self, x150: jax.Array) -> jax.Array:
        x151 = relu_pallas(x150)
        return x151


# ----------------------------- main -------------------------------------------
if __name__ == "__main__":
    key = jax.random.PRNGKey(0)
    # Small NCHW input consistent with the module's forward (original was
    # [1, 1056, 28, 28]); use a small synthetic shape.
    x = jax.random.normal(key, (2, 4, 16, 16), dtype=jnp.float32)

    # Compute the reference BEFORE the kernel call: the kernel donates its
    # input buffer (matching torch's inplace relu_), so x is not read after.
    ref = jax.block_until_ready(jnp.maximum(x, 0.0))
    x_shape, x_dtype = x.shape, x.dtype

    model = MPallas()
    y = jax.block_until_ready(model(x))

    assert y.shape == x_shape and y.dtype == x_dtype
    assert jnp.allclose(y, ref), "Pallas ReLU mismatch vs reference"

    print("KERNEL_OK")
</pallas_src>

<mosaic_0001>
module attributes {stable_mosaic.version = 11 : i64} {
  func.func @_relu_kernel(%arg0: i32, %arg1: memref<16x128xf32, #tpu.memory_space<vmem>>, %arg2: memref<16x128xf32, #tpu.memory_space<vmem>>) attributes {dimension_semantics = [#tpu.dimension_semantics<parallel>], iteration_bounds = array<i64: 1>, scalar_prefetch = 0 : i64, scratch_operands = 0 : i64, tpu.core_type = #tpu.core_type<tc>, window_params = [{transform_indices = @transform_0, window_bounds = array<i64: 16, 128>}, {transform_indices = @transform_1, window_bounds = array<i64: 16, 128>}]} {
    %c0 = arith.constant 0 : index
    %c0_0 = arith.constant 0 : index
    %0 = vector.load %arg1[%c0, %c0_0] : memref<16x128xf32, #tpu.memory_space<vmem>>, vector<16x128xf32>
    %cst = arith.constant 0.000000e+00 : f32
    %1 = vector.broadcast %cst : f32 to vector<16x128xf32>
    %2 = arith.maximumf %0, %1 : vector<16x128xf32>
    %c0_1 = arith.constant 0 : index
    %c0_2 = arith.constant 0 : index
    %3 = vector.load %arg2[%c0_1, %c0_2] : memref<16x128xf32, #tpu.memory_space<vmem>>, vector<16x128xf32>
    tpu.vector_store %arg2[%c0_1, %c0_2], %2 {strides = array<i32>} : memref<16x128xf32, #tpu.memory_space<vmem>>, vector<16x128xf32>,
    return
  }
  func.func @transform_0(%arg0: i32) -> (i32, i32) {
    %c0_i32 = arith.constant 0 : i32
    %c0_i32_0 = arith.constant 0 : i32
    return %arg0, %c0_i32 : i32, i32
  }
  func.func @transform_1(%arg0: i32) -> (i32, i32) {
    %c0_i32 = arith.constant 0 : i32
    %c0_i32_0 = arith.constant 0 : i32
    return %arg0, %c0_i32 : i32, i32
  }
}

</mosaic_0001>

<bundles_post_ra>
// kernel: relu_pallas.1
= control target key start
LH: loop header
LB: loop body
LE: loop exit
PB: predicated region body
PF: predicated region fallthrough
CT: control target
= control target key end

     0   :  { %s40_s0 = inlined_call_operand.vmem [shape: f32[16,128], index: 0, kind: input, shape index: {}, may-alias: {0,1}]   ;;  %s41_s1 = inlined_call_operand.vmem [shape: f32[16,128], index: 1, kind: output, shape index: {}, may-alias: {0,1}]  }
   0x1   :  { %v8_v0 = vld [vmem:[%s40_s0] sm:$0xff]  ;;  %v9_v1 = vld [vmem:[%s40_s0 + $0x8] sm:$0xff] }
   0x2   :  { %v10_v2 = vmax.f32 %v8_v0, 0.0  ;;  %v11_v3 = vmax.f32 %v9_v1, 0.0 }
   0x4   :  { %12 = vst [vmem:[%s41_s1] sm:$0xff] %v10_v2 }
   0x5   :  { %13 = vst [vmem:[%s41_s1 + $0x8] sm:$0xff] %v11_v3 }

</bundles_post_ra>
